<compile_context>
chip_gen: v7x
topology: tpu7x:2x2x1
jax: 0.10.0
libtpu: 0.0.40
codegen_flags: <defaults>
</compile_context>

<pallas_src>
import jax
import jax.numpy as jnp
from jax.experimental import pallas as pl
from jax.experimental.pallas import tpu as pltpu

EPS = 1e-5


def _bn_train(y, gamma, beta):
    """BatchNorm2d (training mode) on a (C, B) tile: stats over the batch axis."""
    mean = jnp.mean(y, axis=1, keepdims=True)                  # (C, 1)
    var = jnp.mean((y - mean) ** 2, axis=1, keepdims=True)     # biased variance
    return (y - mean) * jax.lax.rsqrt(var + EPS) * gamma + beta


def _conv_center(w, m, bias):
    """y[co, b] = sum_ci w[co, ci] * m[ci, b] + bias[co].

    Tiny C: VPU broadcast-FMAs (skip MXU push/drain). Large C: one MXU matmul.
    """
    c_out, c_in = w.shape
    n = m.shape[1]
    if c_in <= 32:
        acc = jnp.zeros((c_out, n), jnp.float32)
        for ci in range(c_in):
            acc = acc + w[:, ci:ci + 1] * m[ci:ci + 1, :]
        return acc + bias
    return jnp.dot(w, m, preferred_element_type=jnp.float32) + bias


def fca_kernel(a_ref,                          # SMEM (1,1): PReLU slope
               re_ref, im_ref,                 # (F, C*B): rfft2 real/imag, lane = c*B + b
               x_ref,                          # (B, C, H*W)
               w1_ref, b1_ref, g1_ref, be1_ref,
               w2_ref, b2_ref, g2_ref, be2_ref,
               o_ref):                         # (B, C, H*W)
    B, C, _ = x_ref.shape

    # ---- frequency-magnitude pooling: pooled[c, b] = sum_f |X[b, c, f]| ----
    mag = jnp.sqrt(re_ref[...] ** 2 + im_ref[...] ** 2)        # (F, C*B)
    p_flat = jnp.sum(mag, axis=0, keepdims=True)               # (1, C*B)
    # assemble the (C, B) pooled matrix from lane slices (no relayout reshape)
    row_id = jax.lax.broadcasted_iota(jnp.int32, (C, B), 0)
    p = jnp.zeros((C, B), jnp.float32)
    for c in range(C):
        p = p + (row_id == c).astype(jnp.float32) * p_flat[:, c * B:(c + 1) * B]

    # ---- ResidualBlock on the (B, C, 1, 1) pooled tensor ----
    # 3x3 conv with padding=1 on a 1x1 input == center-tap CxC matrix.
    y = _conv_center(w1_ref[...], p, b1_ref[...])
    y = _bn_train(y, g1_ref[...], be1_ref[...])
    a = a_ref[0, 0]                                            # PReLU shared slope (SMEM)
    y = jnp.where(y >= 0.0, y, a * y)
    y = _conv_center(w2_ref[...], y, b2_ref[...])
    y = _bn_train(y, g2_ref[...], be2_ref[...])

    # ---- sigmoid gate + channel attention scaling (lane-dense store) ----
    att = 1.0 / (1.0 + jnp.exp(-(p + y)))                      # (C, B)
    for b in range(B):
        o_ref[b] = x_ref[b] * att[:, b:b + 1]                  # (C, HW) * (C, 1)


def fca_forward(x_nchw, params):
    """FCAModuleWithResNet.forward; input/output are NCHW like the PyTorch module."""
    B, C, H, W = x_nchw.shape
    x = x_nchw.astype(jnp.float32)

    # FFT stays in XLA (no Pallas primitive); everything downstream is fused
    # into a single Pallas kernel.
    xf = jnp.fft.rfft2(x, axes=(-2, -1))                       # (B, C, H, W//2+1)
    F = xf.shape[-2] * xf.shape[-1]
    # (F, C*B) with lane index c*B + b
    re = jnp.transpose(jnp.real(xf), (1, 0, 2, 3)).reshape(C * B, F).T
    im = jnp.transpose(jnp.imag(xf), (1, 0, 2, 3)).reshape(C * B, F).T
    x_flat = x.reshape(B, C, H * W)

    vmem = pl.BlockSpec(memory_space=pltpu.MemorySpace.VMEM)
    smem = pl.BlockSpec(memory_space=pltpu.MemorySpace.SMEM)

    out = pl.pallas_call(
        fca_kernel,
        out_shape=jax.ShapeDtypeStruct((B, C, H * W), jnp.float32),
        in_specs=[smem] + [vmem] * 11,
        out_specs=vmem,
    )(params["prelu_a"], re, im, x_flat,
      params["w1"], params["b1"], params["g1"], params["be1"],
      params["w2"], params["b2"], params["g2"], params["be2"])

    return out.reshape(B, C, H, W)


def init_params(key, channels):
    """Synthetic parameters with the same shapes/init style as the PyTorch module."""
    k1, k2, k3, k4 = jax.random.split(key, 4)
    bound = (channels * 9) ** -0.5
    w1_hwio = jax.random.uniform(k1, (3, 3, channels, channels), jnp.float32, -bound, bound)
    w2_hwio = jax.random.uniform(k2, (3, 3, channels, channels), jnp.float32, -bound, bound)
    b1 = jax.random.uniform(k3, (channels, 1), jnp.float32, -bound, bound)
    b2 = jax.random.uniform(k4, (channels, 1), jnp.float32, -bound, bound)
    ones = jnp.ones((channels, 1), jnp.float32)
    zeros = jnp.zeros((channels, 1), jnp.float32)
    return dict(
        # full 3x3 HWIO weights (used by the pure-JAX reference convolution)
        w1_hwio=w1_hwio, w2_hwio=w2_hwio,
        # center taps in (C_out, C_in) orientation (what the fused kernel uses)
        w1=w1_hwio[1, 1].T, w2=w2_hwio[1, 1].T,
        b1=b1, b2=b2, g1=ones, g2=ones, be1=zeros, be2=zeros,
        prelu_a=jnp.full((1, 1), 0.25, jnp.float32),            # PReLU default init
    )


def reference_forward(x_nchw, params):
    """Pure-JAX reference using the FULL 3x3 convolutions (independently
    validates the center-tap simplification inside the kernel)."""
    B, C, H, W = x_nchw.shape
    x = x_nchw.astype(jnp.float32)
    xf = jnp.fft.rfft2(x, axes=(-2, -1))
    pooled = jnp.sum(jnp.abs(xf), axis=(-2, -1))                # (B, C)
    h = pooled.reshape(B, 1, 1, C)                              # NHWC, 1x1 spatial

    def conv3x3(inp, w_hwio, bias):
        y = jax.lax.conv_general_dilated(
            inp, w_hwio, (1, 1), "SAME",
            dimension_numbers=("NHWC", "HWIO", "NHWC"))
        return y + bias.reshape(1, 1, 1, -1)

    def bn(y, g, be):
        m = jnp.mean(y, axis=(0, 1, 2), keepdims=True)
        v = jnp.mean((y - m) ** 2, axis=(0, 1, 2), keepdims=True)
        return ((y - m) * jax.lax.rsqrt(v + EPS) * g.reshape(1, 1, 1, -1)
                + be.reshape(1, 1, 1, -1))

    y = bn(conv3x3(h, params["w1_hwio"], params["b1"]), params["g1"], params["be1"])
    a = params["prelu_a"][0, 0]
    y = jnp.where(y >= 0.0, y, a * y)
    y = bn(conv3x3(y, params["w2_hwio"], params["b2"]), params["g2"], params["be2"])
    att = jax.nn.sigmoid((h + y).reshape(B, C))
    return x * att[:, :, None, None]


if __name__ == "__main__":
    key = jax.random.PRNGKey(0)
    kx, kp = jax.random.split(key)
    N, C, H, W = 2, 4, 16, 16
    # Small amplitude keeps the frequency-pooled attention logits in sigmoid's
    # non-saturated range, so the correctness check is discriminative.
    x = 1e-3 * jax.random.normal(kx, (N, C, H, W), jnp.float32)
    params = init_params(kp, C)

    fca = jax.jit(fca_forward)
    out = jax.block_until_ready(fca(x, params))
    ref = reference_forward(x, params)

    assert out.shape == (N, C, H, W)
    if not jnp.allclose(out, ref, rtol=1e-3, atol=1e-5):
        max_err = jnp.max(jnp.abs(out - ref))
        raise AssertionError(
            f"Pallas output does not match JAX reference (max abs err {max_err})")
    print("KERNEL_OK")
</pallas_src>

<mosaic_0001>
module attributes {stable_mosaic.version = 11 : i64} {
  func.func @fca_kernel(%arg0: memref<1x1xf32, #tpu.memory_space<smem>>, %arg1: memref<144x8xf32, #tpu.memory_space<vmem>>, %arg2: memref<144x8xf32, #tpu.memory_space<vmem>>, %arg3: memref<2x4x256xf32, #tpu.memory_space<vmem>>, %arg4: memref<4x4xf32, #tpu.memory_space<vmem>>, %arg5: memref<4x1xf32, #tpu.memory_space<vmem>>, %arg6: memref<4x1xf32, #tpu.memory_space<vmem>>, %arg7: memref<4x1xf32, #tpu.memory_space<vmem>>, %arg8: memref<4x4xf32, #tpu.memory_space<vmem>>, %arg9: memref<4x1xf32, #tpu.memory_space<vmem>>, %arg10: memref<4x1xf32, #tpu.memory_space<vmem>>, %arg11: memref<4x1xf32, #tpu.memory_space<vmem>>, %arg12: memref<2x4x256xf32, #tpu.memory_space<vmem>>) attributes {dimension_semantics = [], scalar_prefetch = 0 : i64, scratch_operands = 0 : i64, tpu.core_type = #tpu.core_type<tc>} {
    %c0 = arith.constant 0 : index
    %c0_0 = arith.constant 0 : index
    %0 = vector.load %arg1[%c0, %c0_0] : memref<144x8xf32, #tpu.memory_space<vmem>>, vector<144x8xf32>
    %1 = arith.mulf %0, %0 : vector<144x8xf32>
    %c0_1 = arith.constant 0 : index
    %c0_2 = arith.constant 0 : index
    %2 = vector.load %arg2[%c0_1, %c0_2] : memref<144x8xf32, #tpu.memory_space<vmem>>, vector<144x8xf32>
    %3 = arith.mulf %2, %2 : vector<144x8xf32>
    %4 = arith.addf %1, %3 : vector<144x8xf32>
    %5 = math.sqrt %4 : vector<144x8xf32>
    %cst = arith.constant dense<0.000000e+00> : vector<8xf32>
    %6 = vector.multi_reduction <add>, %5, %cst [0] : vector<144x8xf32> to vector<8xf32>
    %7 = vector.shape_cast %6 : vector<8xf32> to vector<1x8xf32>
    %8 = tpu.iota {dimensions = array<i32: 0>} : vector<4x2xi32>
    %cst_3 = arith.constant 0.000000e+00 : f32
    %9 = vector.broadcast %cst_3 : f32 to vector<4x2xf32>
    %c0_i32 = arith.constant 0 : i32
    %10 = vector.broadcast %c0_i32 : i32 to vector<4x2xi32>
    %11 = arith.cmpi eq, %8, %10 : vector<4x2xi32>
    %12 = arith.extui %11 : vector<4x2xi1> to vector<4x2xi32>
    %13 = arith.sitofp %12 : vector<4x2xi32> to vector<4x2xf32>
    %14 = vector.extract_strided_slice %7 {offsets = [0, 0], sizes = [1, 2], strides = [1, 1]} : vector<1x8xf32> to vector<1x2xf32>
    %15 = vector.broadcast %14 : vector<1x2xf32> to vector<4x2xf32>
    %16 = arith.mulf %13, %15 : vector<4x2xf32>
    %17 = arith.addf %9, %16 : vector<4x2xf32>
    %c1_i32 = arith.constant 1 : i32
    %18 = vector.broadcast %c1_i32 : i32 to vector<4x2xi32>
    %19 = arith.cmpi eq, %8, %18 : vector<4x2xi32>
    %20 = arith.extui %19 : vector<4x2xi1> to vector<4x2xi32>
    %21 = arith.sitofp %20 : vector<4x2xi32> to vector<4x2xf32>
    %22 = vector.extract_strided_slice %7 {offsets = [0, 2], sizes = [1, 2], strides = [1, 1]} : vector<1x8xf32> to vector<1x2xf32>
    %23 = vector.broadcast %22 : vector<1x2xf32> to vector<4x2xf32>
    %24 = arith.mulf %21, %23 : vector<4x2xf32>
    %25 = arith.addf %17, %24 : vector<4x2xf32>
    %c2_i32 = arith.constant 2 : i32
    %26 = vector.broadcast %c2_i32 : i32 to vector<4x2xi32>
    %27 = arith.cmpi eq, %8, %26 : vector<4x2xi32>
    %28 = arith.extui %27 : vector<4x2xi1> to vector<4x2xi32>
    %29 = arith.sitofp %28 : vector<4x2xi32> to vector<4x2xf32>
    %30 = vector.extract_strided_slice %7 {offsets = [0, 4], sizes = [1, 2], strides = [1, 1]} : vector<1x8xf32> to vector<1x2xf32>
    %31 = vector.broadcast %30 : vector<1x2xf32> to vector<4x2xf32>
    %32 = arith.mulf %29, %31 : vector<4x2xf32>
    %33 = arith.addf %25, %32 : vector<4x2xf32>
    %c3_i32 = arith.constant 3 : i32
    %34 = vector.broadcast %c3_i32 : i32 to vector<4x2xi32>
    %35 = arith.cmpi eq, %8, %34 : vector<4x2xi32>
    %36 = arith.extui %35 : vector<4x2xi1> to vector<4x2xi32>
    %37 = arith.sitofp %36 : vector<4x2xi32> to vector<4x2xf32>
    %38 = vector.extract_strided_slice %7 {offsets = [0, 6], sizes = [1, 2], strides = [1, 1]} : vector<1x8xf32> to vector<1x2xf32>
    %39 = vector.broadcast %38 : vector<1x2xf32> to vector<4x2xf32>
    %40 = arith.mulf %37, %39 : vector<4x2xf32>
    %41 = arith.addf %33, %40 : vector<4x2xf32>
    %c0_4 = arith.constant 0 : index
    %c0_5 = arith.constant 0 : index
    %42 = vector.load %arg4[%c0_4, %c0_5] : memref<4x4xf32, #tpu.memory_space<vmem>>, vector<4x4xf32>
    %c0_6 = arith.constant 0 : index
    %c0_7 = arith.constant 0 : index
    %43 = vector.load %arg5[%c0_6, %c0_7] : memref<4x1xf32, #tpu.memory_space<vmem>>, vector<4x1xf32>
    %cst_8 = arith.constant 0.000000e+00 : f32
    %44 = vector.broadcast %cst_8 : f32 to vector<4x2xf32>
    %45 = vector.extract_strided_slice %42 {offsets = [0, 0], sizes = [4, 1], strides = [1, 1]} : vector<4x4xf32> to vector<4x1xf32>
    %46 = vector.extract_strided_slice %41 {offsets = [0, 0], sizes = [1, 2], strides = [1, 1]} : vector<4x2xf32> to vector<1x2xf32>
    %47 = vector.broadcast %45 : vector<4x1xf32> to vector<4x2xf32>
    %48 = vector.broadcast %46 : vector<1x2xf32> to vector<4x2xf32>
    %49 = arith.mulf %47, %48 : vector<4x2xf32>
    %50 = arith.addf %44, %49 : vector<4x2xf32>
    %51 = vector.extract_strided_slice %42 {offsets = [0, 1], sizes = [4, 1], strides = [1, 1]} : vector<4x4xf32> to vector<4x1xf32>
    %52 = vector.extract_strided_slice %41 {offsets = [1, 0], sizes = [1, 2], strides = [1, 1]} : vector<4x2xf32> to vector<1x2xf32>
    %53 = vector.broadcast %51 : vector<4x1xf32> to vector<4x2xf32>
    %54 = vector.broadcast %52 : vector<1x2xf32> to vector<4x2xf32>
    %55 = arith.mulf %53, %54 : vector<4x2xf32>
    %56 = arith.addf %50, %55 : vector<4x2xf32>
    %57 = vector.extract_strided_slice %42 {offsets = [0, 2], sizes = [4, 1], strides = [1, 1]} : vector<4x4xf32> to vector<4x1xf32>
    %58 = vector.extract_strided_slice %41 {offsets = [2, 0], sizes = [1, 2], strides = [1, 1]} : vector<4x2xf32> to vector<1x2xf32>
    %59 = vector.broadcast %57 : vector<4x1xf32> to vector<4x2xf32>
    %60 = vector.broadcast %58 : vector<1x2xf32> to vector<4x2xf32>
    %61 = arith.mulf %59, %60 : vector<4x2xf32>
    %62 = arith.addf %56, %61 : vector<4x2xf32>
    %63 = vector.extract_strided_slice %42 {offsets = [0, 3], sizes = [4, 1], strides = [1, 1]} : vector<4x4xf32> to vector<4x1xf32>
    %64 = vector.extract_strided_slice %41 {offsets = [3, 0], sizes = [1, 2], strides = [1, 1]} : vector<4x2xf32> to vector<1x2xf32>
    %65 = vector.broadcast %63 : vector<4x1xf32> to vector<4x2xf32>
    %66 = vector.broadcast %64 : vector<1x2xf32> to vector<4x2xf32>
    %67 = arith.mulf %65, %66 : vector<4x2xf32>
    %68 = arith.addf %62, %67 : vector<4x2xf32>
    %69 = vector.broadcast %43 : vector<4x1xf32> to vector<4x2xf32>
    %70 = arith.addf %68, %69 : vector<4x2xf32>
    %c0_9 = arith.constant 0 : index
    %c0_10 = arith.constant 0 : index
    %71 = vector.load %arg6[%c0_9, %c0_10] : memref<4x1xf32, #tpu.memory_space<vmem>>, vector<4x1xf32>
    %c0_11 = arith.constant 0 : index
    %c0_12 = arith.constant 0 : index
    %72 = vector.load %arg7[%c0_11, %c0_12] : memref<4x1xf32, #tpu.memory_space<vmem>>, vector<4x1xf32>
    %cst_13 = arith.constant dense<0.000000e+00> : vector<4xf32>
    %73 = vector.multi_reduction <add>, %70, %cst_13 [1] : vector<4x2xf32> to vector<4xf32>
    %74 = vector.shape_cast %73 : vector<4xf32> to vector<4x1xf32>
    %cst_14 = arith.constant 2.000000e+00 : f32
    %75 = vector.broadcast %cst_14 : f32 to vector<4x1xf32>
    %76 = arith.divf %74, %75 : vector<4x1xf32>
    %77 = vector.broadcast %76 : vector<4x1xf32> to vector<4x2xf32>
    %78 = arith.subf %70, %77 : vector<4x2xf32>
    %79 = arith.mulf %78, %78 : vector<4x2xf32>
    %cst_15 = arith.constant dense<0.000000e+00> : vector<4xf32>
    %80 = vector.multi_reduction <add>, %79, %cst_15 [1] : vector<4x2xf32> to vector<4xf32>
    %81 = vector.shape_cast %80 : vector<4xf32> to vector<4x1xf32>
    %cst_16 = arith.constant 2.000000e+00 : f32
    %82 = vector.broadcast %cst_16 : f32 to vector<4x1xf32>
    %83 = arith.divf %81, %82 : vector<4x1xf32>
    %84 = vector.broadcast %76 : vector<4x1xf32> to vector<4x2xf32>
    %85 = arith.subf %70, %84 : vector<4x2xf32>
    %cst_17 = arith.constant 9.99999974E-6 : f32
    %86 = vector.broadcast %cst_17 : f32 to vector<4x1xf32>
    %87 = arith.addf %83, %86 : vector<4x1xf32>
    %88 = math.rsqrt %87 : vector<4x1xf32>
    %89 = vector.broadcast %88 : vector<4x1xf32> to vector<4x2xf32>
    %90 = arith.mulf %85, %89 : vector<4x2xf32>
    %91 = vector.broadcast %71 : vector<4x1xf32> to vector<4x2xf32>
    %92 = arith.mulf %90, %91 : vector<4x2xf32>
    %93 = vector.broadcast %72 : vector<4x1xf32> to vector<4x2xf32>
    %94 = arith.addf %92, %93 : vector<4x2xf32>
    %c0_18 = arith.constant 0 : index
    %c0_19 = arith.constant 0 : index
    %95 = memref.load %arg0[%c0_18, %c0_19] : memref<1x1xf32, #tpu.memory_space<smem>>
    %cst_20 = arith.constant 0.000000e+00 : f32
    %96 = vector.broadcast %cst_20 : f32 to vector<4x2xf32>
    %97 = arith.cmpf oge, %94, %96 : vector<4x2xf32>
    %98 = vector.broadcast %95 : f32 to vector<4x2xf32>
    %99 = arith.mulf %98, %94 : vector<4x2xf32>
    %100 = arith.select %97, %94, %99 : vector<4x2xi1>, vector<4x2xf32>
    %c0_21 = arith.constant 0 : index
    %c0_22 = arith.constant 0 : index
    %101 = vector.load %arg8[%c0_21, %c0_22] : memref<4x4xf32, #tpu.memory_space<vmem>>, vector<4x4xf32>
    %c0_23 = arith.constant 0 : index
    %c0_24 = arith.constant 0 : index
    %102 = vector.load %arg9[%c0_23, %c0_24] : memref<4x1xf32, #tpu.memory_space<vmem>>, vector<4x1xf32>
    %cst_25 = arith.constant 0.000000e+00 : f32
    %103 = vector.broadcast %cst_25 : f32 to vector<4x2xf32>
    %104 = vector.extract_strided_slice %101 {offsets = [0, 0], sizes = [4, 1], strides = [1, 1]} : vector<4x4xf32> to vector<4x1xf32>
    %105 = vector.extract_strided_slice %100 {offsets = [0, 0], sizes = [1, 2], strides = [1, 1]} : vector<4x2xf32> to vector<1x2xf32>
    %106 = vector.broadcast %104 : vector<4x1xf32> to vector<4x2xf32>
    %107 = vector.broadcast %105 : vector<1x2xf32> to vector<4x2xf32>
    %108 = arith.mulf %106, %107 : vector<4x2xf32>
    %109 = arith.addf %103, %108 : vector<4x2xf32>
    %110 = vector.extract_strided_slice %101 {offsets = [0, 1], sizes = [4, 1], strides = [1, 1]} : vector<4x4xf32> to vector<4x1xf32>
    %111 = vector.extract_strided_slice %100 {offsets = [1, 0], sizes = [1, 2], strides = [1, 1]} : vector<4x2xf32> to vector<1x2xf32>
    %112 = vector.broadcast %110 : vector<4x1xf32> to vector<4x2xf32>
    %113 = vector.broadcast %111 : vector<1x2xf32> to vector<4x2xf32>
    %114 = arith.mulf %112, %113 : vector<4x2xf32>
    %115 = arith.addf %109, %114 : vector<4x2xf32>
    %116 = vector.extract_strided_slice %101 {offsets = [0, 2], sizes = [4, 1], strides = [1, 1]} : vector<4x4xf32> to vector<4x1xf32>
    %117 = vector.extract_strided_slice %100 {offsets = [2, 0], sizes = [1, 2], strides = [1, 1]} : vector<4x2xf32> to vector<1x2xf32>
    %118 = vector.broadcast %116 : vector<4x1xf32> to vector<4x2xf32>
    %119 = vector.broadcast %117 : vector<1x2xf32> to vector<4x2xf32>
    %120 = arith.mulf %118, %119 : vector<4x2xf32>
    %121 = arith.addf %115, %120 : vector<4x2xf32>
    %122 = vector.extract_strided_slice %101 {offsets = [0, 3], sizes = [4, 1], strides = [1, 1]} : vector<4x4xf32> to vector<4x1xf32>
    %123 = vector.extract_strided_slice %100 {offsets = [3, 0], sizes = [1, 2], strides = [1, 1]} : vector<4x2xf32> to vector<1x2xf32>
    %124 = vector.broadcast %122 : vector<4x1xf32> to vector<4x2xf32>
    %125 = vector.broadcast %123 : vector<1x2xf32> to vector<4x2xf32>
    %126 = arith.mulf %124, %125 : vector<4x2xf32>
    %127 = arith.addf %121, %126 : vector<4x2xf32>
    %128 = vector.broadcast %102 : vector<4x1xf32> to vector<4x2xf32>
    %129 = arith.addf %127, %128 : vector<4x2xf32>
    %c0_26 = arith.constant 0 : index
    %c0_27 = arith.constant 0 : index
    %130 = vector.load %arg10[%c0_26, %c0_27] : memref<4x1xf32, #tpu.memory_space<vmem>>, vector<4x1xf32>
    %c0_28 = arith.constant 0 : index
    %c0_29 = arith.constant 0 : index
    %131 = vector.load %arg11[%c0_28, %c0_29] : memref<4x1xf32, #tpu.memory_space<vmem>>, vector<4x1xf32>
    %cst_30 = arith.constant dense<0.000000e+00> : vector<4xf32>
    %132 = vector.multi_reduction <add>, %129, %cst_30 [1] : vector<4x2xf32> to vector<4xf32>
    %133 = vector.shape_cast %132 : vector<4xf32> to vector<4x1xf32>
    %cst_31 = arith.constant 2.000000e+00 : f32
    %134 = vector.broadcast %cst_31 : f32 to vector<4x1xf32>
    %135 = arith.divf %133, %134 : vector<4x1xf32>
    %136 = vector.broadcast %135 : vector<4x1xf32> to vector<4x2xf32>
    %137 = arith.subf %129, %136 : vector<4x2xf32>
    %138 = arith.mulf %137, %137 : vector<4x2xf32>
    %cst_32 = arith.constant dense<0.000000e+00> : vector<4xf32>
    %139 = vector.multi_reduction <add>, %138, %cst_32 [1] : vector<4x2xf32> to vector<4xf32>
    %140 = vector.shape_cast %139 : vector<4xf32> to vector<4x1xf32>
    %cst_33 = arith.constant 2.000000e+00 : f32
    %141 = vector.broadcast %cst_33 : f32 to vector<4x1xf32>
    %142 = arith.divf %140, %141 : vector<4x1xf32>
    %143 = vector.broadcast %135 : vector<4x1xf32> to vector<4x2xf32>
    %144 = arith.subf %129, %143 : vector<4x2xf32>
    %cst_34 = arith.constant 9.99999974E-6 : f32
    %145 = vector.broadcast %cst_34 : f32 to vector<4x1xf32>
    %146 = arith.addf %142, %145 : vector<4x1xf32>
    %147 = math.rsqrt %146 : vector<4x1xf32>
    %148 = vector.broadcast %147 : vector<4x1xf32> to vector<4x2xf32>
    %149 = arith.mulf %144, %148 : vector<4x2xf32>
    %150 = vector.broadcast %130 : vector<4x1xf32> to vector<4x2xf32>
    %151 = arith.mulf %149, %150 : vector<4x2xf32>
    %152 = vector.broadcast %131 : vector<4x1xf32> to vector<4x2xf32>
    %153 = arith.addf %151, %152 : vector<4x2xf32>
    %154 = arith.addf %41, %153 : vector<4x2xf32>
    %cst_35 = arith.constant 0.000000e+00 : f32
    %155 = vector.broadcast %cst_35 : f32 to vector<4x2xf32>
    %156 = arith.subf %155, %154 : vector<4x2xf32>
    %157 = math.exp %156 : vector<4x2xf32>
    %cst_36 = arith.constant 1.000000e+00 : f32
    %158 = vector.broadcast %cst_36 : f32 to vector<4x2xf32>
    %159 = arith.addf %158, %157 : vector<4x2xf32>
    %cst_37 = arith.constant 1.000000e+00 : f32
    %160 = vector.broadcast %cst_37 : f32 to vector<4x2xf32>
    %161 = arith.divf %160, %159 : vector<4x2xf32>
    %c0_38 = arith.constant 0 : index
    %c0_39 = arith.constant 0 : index
    %c0_40 = arith.constant 0 : index
    %162 = vector.load %arg3[%c0_38, %c0_39, %c0_40] : memref<2x4x256xf32, #tpu.memory_space<vmem>>, vector<1x4x256xf32>
    %163 = vector.shape_cast %162 : vector<1x4x256xf32> to vector<4x256xf32>
    %164 = vector.extract_strided_slice %161 {offsets = [0, 0], sizes = [4, 1], strides = [1, 1]} : vector<4x2xf32> to vector<4x1xf32>
    %165 = vector.broadcast %164 : vector<4x1xf32> to vector<4x256xf32>
    %166 = arith.mulf %163, %165 : vector<4x256xf32>
    %c0_41 = arith.constant 0 : index
    %c0_42 = arith.constant 0 : index
    %c0_43 = arith.constant 0 : index
    %167 = vector.load %arg12[%c0_41, %c0_42, %c0_43] : memref<2x4x256xf32, #tpu.memory_space<vmem>>, vector<1x4x256xf32>
    %168 = vector.shape_cast %167 : vector<1x4x256xf32> to vector<4x256xf32>
    %169 = vector.shape_cast %166 : vector<4x256xf32> to vector<1x4x256xf32>
    tpu.vector_store %arg12[%c0_41, %c0_42, %c0_43], %169 {strides = array<i32>} : memref<2x4x256xf32, #tpu.memory_space<vmem>>, vector<1x4x256xf32>,
    %c1 = arith.constant 1 : index
    %c0_44 = arith.constant 0 : index
    %c0_45 = arith.constant 0 : index
    %170 = vector.load %arg3[%c1, %c0_44, %c0_45] : memref<2x4x256xf32, #tpu.memory_space<vmem>>, vector<1x4x256xf32>
    %171 = vector.shape_cast %170 : vector<1x4x256xf32> to vector<4x256xf32>
    %172 = vector.extract_strided_slice %161 {offsets = [0, 1], sizes = [4, 1], strides = [1, 1]} : vector<4x2xf32> to vector<4x1xf32>
    %173 = vector.broadcast %172 : vector<4x1xf32> to vector<4x256xf32>
    %174 = arith.mulf %171, %173 : vector<4x256xf32>
    %c1_46 = arith.constant 1 : index
    %c0_47 = arith.constant 0 : index
    %c0_48 = arith.constant 0 : index
    %175 = vector.load %arg12[%c1_46, %c0_47, %c0_48] : memref<2x4x256xf32, #tpu.memory_space<vmem>>, vector<1x4x256xf32>
    %176 = vector.shape_cast %175 : vector<1x4x256xf32> to vector<4x256xf32>
    %177 = vector.shape_cast %174 : vector<4x256xf32> to vector<1x4x256xf32>
    tpu.vector_store %arg12[%c1_46, %c0_47, %c0_48], %177 {strides = array<i32>} : memref<2x4x256xf32, #tpu.memory_space<vmem>>, vector<1x4x256xf32>,
    return
  }
}

</mosaic_0001>

<bundles_post_ra>
// kernel: fca_forward.1
= control target key start
LH: loop header
LB: loop body
LE: loop exit
PB: predicated region body
PF: predicated region fallthrough
CT: control target
= control target key end

     0   :  { %v606_v0 = vmov 1   ;;  %v607_v2 = vmov 0   ;;  %v608_v3 = vmov 2   ;;  %v609_v8 = vmov 3   ;;  %s613_s19 = smov 122   ;;  %s1075_s4 = inlined_call_operand.vmem [shape: f32[4,4], index: 4, kind: input, shape index: {}]   ;;  %s1076_s1 = inlined_call_operand.vmem [shape: f32[144,8], index: 1, kind: input, shape index: {}]   ;;  %s1077_s2 = inlined_call_operand.vmem [shape: f32[144,8], index: 2, kind: input, shape index: {}]   ;;  %s1078_s5 = inlined_call_operand.vmem [shape: f32[4,1], index: 5, kind: input, shape index: {}]   ;;  %s1079_s7 = inlined_call_operand.vmem [shape: f32[4,1], index: 7, kind: input, shape index: {}]   ;;  %s1080_s8 = inlined_call_operand.vmem [shape: f32[4,4], index: 8, kind: input, shape index: {}]   ;;  %s1081_s6 = inlined_call_operand.vmem [shape: f32[4,1], index: 6, kind: input, shape index: {}]   ;;  %s1082_s9 = inlined_call_operand.vmem [shape: f32[4,1], index: 9, kind: input, shape index: {}]   ;;  %s1083_s0 = inlined_call_operand.<no memory space> [shape: f32[1,1], index: 0, kind: input, shape index: {}]   ;;  %s1084_s10 = inlined_call_operand.vmem [shape: f32[4,1], index: 10, kind: input, shape index: {}]   ;;  %s1085_s11 = inlined_call_operand.vmem [shape: f32[4,1], index: 11, kind: input, shape index: {}]   ;;  %s1086_s3 = inlined_call_operand.vmem [shape: f32[2,4,256], index: 3, kind: input, shape index: {}]   ;;  %s1087_s12 = inlined_call_operand.vmem [shape: f32[2,4,256], index: 12, kind: output, shape index: {}]  }
   0x1   :  { %551 = vset.pattern.permute.xlu1 %v606_v0  ;;  %v684_v1 = vld [vmem:[%s1075_s4] sm:$0xf]  ;;  %550 = vset.pattern.permute.xlu0 %v607_v2  ;;  %v43_v6 = vld [vmem:[%s1076_s1 + $0x8] sm:$0xff]  ;;  %v44_v9 = vld [vmem:[%s1076_s1 + $0x10] sm:$0xff]  ;;  %vm258_vm2 = vcmask 64512  }
   0x2   :  { %348 = vperm.xlu1 %551, %v684_v1   ;;  %338 = vperm.xlu0 %550, %v684_v1   ;;  %v42_v4 = vld [vmem:[%s1076_s1] sm:$0xff]  ;;  %v79_v7 = vld [vmem:[%s1077_s2 + $0x8] sm:$0xff]  ;;  %v80_v10 = vld [vmem:[%s1077_s2 + $0x10] sm:$0xff]  ;;  %v61_v14 = vmul.f32 %v43_v6, %v43_v6  ;;  %v62_v17 = vmul.f32 %v44_v9, %v44_v9 }
   0x3   :  { %v78_v5 = vld [vmem:[%s1077_s2] sm:$0xff]  ;;  %v60_v11 = vmul.f32 %v42_v4, %v42_v4  ;;  %v45_v13 = vld [vmem:[%s1076_s1 + $0x18] sm:$0xff]  ;;  %v97_v16 = vmul.f32 %v79_v7, %v79_v7  ;;  %v98_v18 = vmul.f32 %v80_v10, %v80_v10  ;;  %v47_v24 = vld [vmem:[%s1076_s1 + $0x28] sm:$0xff] }
   0x4   :  { %v96_v12 = vmul.f32 %v78_v5, %v78_v5  ;;  %v81_v15 = vld [vmem:[%s1077_s2 + $0x18] sm:$0xff]  ;;  %v46_v19 = vld [vmem:[%s1076_s1 + $0x20] sm:$0xff]  ;;  %v63_v21 = vmul.f32 %v45_v13, %v45_v13  ;;  %v83_v25 = vld [vmem:[%s1077_s2 + $0x28] sm:$0xff]  ;;  %v65_v36 = vmul.f32 %v47_v24, %v47_v24 }
   0x5   :  { %v82_v20 = vld [vmem:[%s1077_s2 + $0x20] sm:$0xff]  ;;  %v99_v22 = vmul.f32 %v81_v15, %v81_v15  ;;  %v730_v26 = vadd.f32 %v97_v16, %v61_v14  ;;  %v64_v27 = vmul.f32 %v46_v19, %v46_v19  ;;  %v732_v29 = vadd.f32 %v98_v18, %v62_v17  ;;  %v48_v30 = vld [vmem:[%s1076_s1 + $0x30] sm:$0xff]  ;;  %v49_v31 = vld [vmem:[%s1076_s1 + $0x38] sm:$0xff] }
   0x6   :  { %552 = vset.pattern.permute.xlu1 %v608_v3  ;;  %v722_v23 = vadd.f32 %v96_v12, %v60_v11  ;;  %v100_v28 = vmul.f32 %v82_v20, %v82_v20  ;;  %v84_v32 = vld [vmem:[%s1077_s2 + $0x30] sm:$0xff]  ;;  %v50_v33 = vld [vmem:[%s1076_s1 + $0x40] sm:$0xff]  ;;  %v51_v34 = vld [vmem:[%s1076_s1 + $0x48] sm:$0xff]  ;;  %v101_v37 = vmul.f32 %v83_v25, %v83_v25  ;;  %v66_v45 = vmul.f32 %v48_v30, %v48_v30 }
   0x7   :  { %358 = vperm.xlu1 %552, %v684_v1   ;;  %v52_v35 = vld [vmem:[%s1076_s1 + $0x50] sm:$0xff]  ;;  %v752_v38 = vadd.f32 %v99_v22, %v63_v21  ;;  %v53_v39 = vld [vmem:[%s1076_s1 + $0x58] sm:$0xff]  ;;  %v54_v40 = vld [vmem:[%s1076_s1 + $0x60] sm:$0xff]  ;;  %v102_v46 = vmul.f32 %v84_v32, %v84_v32  ;;  %v67_v48 = vmul.f32 %v49_v31, %v49_v31  ;;  %v68_v49 = vmul.f32 %v50_v33, %v50_v33 }
   0x8   :  { %562 = vrsqrt.f32 %v722_v23  ;;  %v85_v41 = vld [vmem:[%s1077_s2 + $0x38] sm:$0xff]  ;;  %v55_v42 = vld [vmem:[%s1076_s1 + $0x68] sm:$0xff]  ;;  %v56_v43 = vld [vmem:[%s1076_s1 + $0x70] sm:$0xff]  ;;  %v774_v47 = vadd.f32 %v100_v28, %v64_v27  ;;  %v69_v50 = vmul.f32 %v51_v34, %v51_v34  ;;  %v70_v51 = vmul.f32 %v52_v35, %v52_v35 }
   0x9   :  { %564 = vrsqrt.f32 %v730_v26  ;;  %v57_v44 = vld [vmem:[%s1076_s1 + $0x78] sm:$0xff]  ;;  %v86_v52 = vld [vmem:[%s1077_s2 + $0x40] sm:$0xff]  ;;  %v87_v53 = vld [vmem:[%s1077_s2 + $0x48] sm:$0xff]  ;;  %v71_v55 = vmul.f32 %v53_v39, %v53_v39  ;;  %v103_v59 = vmul.f32 %v85_v41, %v85_v41  ;;  %v795_v60 = vadd.f32 %v101_v37, %v65_v36 }
   0xa   :  { %566 = vrsqrt.f32 %v732_v29  ;;  %v88_v54 = vld [vmem:[%s1077_s2 + $0x50] sm:$0xff]  ;;  %v89_v56 = vld [vmem:[%s1077_s2 + $0x58] sm:$0xff]  ;;  %v90_v57 = vld [vmem:[%s1077_s2 + $0x60] sm:$0xff]  ;;  %v72_v62 = vmul.f32 %v54_v40, %v54_v40  ;;  %v73_v63 = vmul.f32 %v55_v42, %v55_v42  ;;  %v74_v4 = vmul.f32 %v56_v43, %v56_v43 }
   0xb   :  { %553 = vset.pattern.permute.xlu1 %v609_v8  ;;  %v91_v58 = vld [vmem:[%s1077_s2 + $0x68] sm:$0xff]  ;;  %568 = vrsqrt.f32 %v752_v38  ;;  %v58_v61 = vld [vmem:[%s1076_s1 + $0x80] sm:$0xff]  ;;  %v75_v5 = vmul.f32 %v57_v44, %v57_v44  ;;  %v92_v6 = vld [vmem:[%s1077_s2 + $0x70] sm:$0xff]  ;;  %v104_v12 = vmul.f32 %v86_v52, %v86_v52  ;;  %v105_v13 = vmul.f32 %v87_v53, %v87_v53 }
   0xc   :  { %v93_v7 = vld [vmem:[%s1077_s2 + $0x78] sm:$0xff]  ;;  %v59_v9 = vld [vmem:[%s1076_s1 + $0x88] sm:$0xff]  ;;  %v94_v10 = vld [vmem:[%s1077_s2 + $0x80] sm:$0xff]  ;;  %v816_v14 = vadd.f32 %v102_v46, %v66_v45  ;;  %570 = vrsqrt.f32 %v774_v47  ;;  %v106_v15 = vmul.f32 %v88_v54, %v88_v54  ;;  %v107_v16 = vmul.f32 %v89_v56, %v89_v56  ;;  %s611_s1 = smov 124  }
   0xd   :  { %v95_v11 = vld [vmem:[%s1077_s2 + $0x88] sm:$0xff]  ;;  %v108_v17 = vmul.f32 %v90_v57, %v90_v57  ;;  %v109_v18 = vmul.f32 %v91_v58, %v91_v58  ;;  %v110_v19 = vmul.f32 %v92_v6, %v92_v6  ;;  %v111_v20 = vmul.f32 %v93_v7, %v93_v7  ;;  %s612_s2 = smov 126  }
   0xe   :  { %v819_v21 = vadd.f32 %v103_v59, %v67_v48  ;;  %572 = vrsqrt.f32 %v795_v60  ;;  %v76_v22 = vmul.f32 %v58_v61, %v58_v61  ;;  %v77_v24 = vmul.f32 %v59_v9, %v59_v9 }
   0xf   :  { %v112_v25 = vmul.f32 %v94_v10, %v94_v10  ;;  %v113_v27 = vmul.f32 %v95_v11, %v95_v11  ;;  %v822_v30 = vadd.f32 %v104_v12, %v68_v49  ;;  %574 = vrsqrt.f32 %v816_v14 }
  0x10   :  { %v825_v32 = vadd.f32 %v105_v13, %v69_v50  ;;  %v827_v33 = vadd.f32 %v106_v15, %v70_v51  ;;  %v829_v34 = vadd.f32 %v107_v16, %v71_v55  ;;  %v831_v35 = vadd.f32 %v108_v17, %v72_v62 }
  0x11   :  { %v833_v37 = vadd.f32 %v109_v18, %v73_v63  ;;  %v835_v39 = vadd.f32 %v110_v19, %v74_v4  ;;  %v837_v40 = vadd.f32 %v111_v20, %v75_v5  ;;  %576 = vrsqrt.f32 %v819_v21 }
  0x12   :  { %v563_v28 = vpop.eup %562  ;;  %v840_v41 = vadd.f32 %v112_v25, %v76_v22  ;;  %v842_v42 = vadd.f32 %v113_v27, %v77_v24  ;;  %vm134_vm0 = vcmp.eq.f32.partialorder %v722_v23, inf  ;;  %vm136_vm1 = vcmp.eq.f32.partialorder %v722_v23, 0.0 }
  0x13   :  { %v565_v31 = vpop.eup %564  ;;  %v133_v44 = vmul.f32 %v563_v28, %v722_v23  ;;  %v137_v45 = vand.u32 2147483648, %v722_v23  ;;  %vm141_vm3 = vcmp.eq.f32.partialorder %v730_v26, inf  ;;  %578 = vrsqrt.f32 %v822_v30 }
  0x14   :  { %v567_v36 = vpop.eup %566  ;;  %v140_v46 = vmul.f32 %v565_v31, %v730_v26  ;;  %vm143_vm4 = vcmp.eq.f32.partialorder %v730_v26, 0.0  ;;  %v144_v48 = vand.u32 2147483648, %v730_v26  ;;  %vm148_vm5 = vcmp.eq.f32.partialorder %v732_v29, inf }
  0x15   :  { %v569_v43 = vpop.eup %568  ;;  %v147_v49 = vmul.f32 %v567_v36, %v732_v29  ;;  %vm150_vm6 = vcmp.eq.f32.partialorder %v732_v29, 0.0  ;;  %v151_v51 = vand.u32 2147483648, %v732_v29  ;;  %580 = vrsqrt.f32 %v825_v32 }
  0x16   :  { %v571_v50 = vpop.eup %570  ;;  %v154_v52 = vmul.f32 %v569_v43, %v752_v38  ;;  %vm155_vm7 = vcmp.eq.f32.partialorder %v752_v38, inf  ;;  %vm157_vm8 = vcmp.eq.f32.partialorder %v752_v38, 0.0  ;;  %v158_v53 = vand.u32 2147483648, %v752_v38 }
  0x17   :  { %v135_v55 = vsel %vm134_vm0, %v722_v23, %v133_v44  ;;  %vm162_vm9 = vcmp.eq.f32.partialorder %v774_v47, inf  ;;  %vm164_vm10 = vcmp.eq.f32.partialorder %v774_v47, 0.0  ;;  %582 = vrsqrt.f32 %v827_v33 }
  0x18   :  { %v573_v54 = vpop.eup %572  ;;  %v142_v56 = vsel %vm141_vm3, %v730_v26, %v140_v46  ;;  %v149_v57 = vsel %vm148_vm5, %v732_v29, %v147_v49  ;;  %v161_v58 = vmul.f32 %v571_v50, %v774_v47  ;;  %v165_v59 = vand.u32 2147483648, %v774_v47 }
  0x19   :  { %v575_v61 = vpop.eup %574  ;;  %vm169_vm11 = vcmp.eq.f32.partialorder %v795_v60, inf  ;;  %vm171_vm12 = vcmp.eq.f32.partialorder %v795_v60, 0.0  ;;  %v172_v62 = vand.u32 2147483648, %v795_v60  ;;  %584 = vrsqrt.f32 %v829_v34 }
  0x1a   :  { %v138_v63 = vsel %vm136_vm1, %v137_v45, %v135_v55  ;;  %v156_v4 = vsel %vm155_vm7, %v752_v38, %v154_v52  ;;  %v168_v5 = vmul.f32 %v573_v54, %v795_v60  ;;  %vm176_vm13 = vcmp.eq.f32.partialorder %v816_v14, inf }
  0x1b   :  { %v577_v6 = vpop.eup %576  ;;  %v145_v7 = vsel %vm143_vm4, %v144_v48, %v142_v56  ;;  %v152_v9 = vsel %vm150_vm6, %v151_v51, %v149_v57  ;;  %vm178_vm14 = vcmp.eq.f32.partialorder %v816_v14, 0.0  ;;  %586 = vrsqrt.f32 %v831_v35 }
  0x1c   :  { %v163_v23 = vsel %vm162_vm9, %v774_v47, %v161_v58  ;;  %v175_v10 = vmul.f32 %v575_v61, %v816_v14  ;;  %v179_v11 = vand.u32 2147483648, %v816_v14  ;;  %vm183_vm15 = vcmp.eq.f32.partialorder %v819_v21, inf }
  0x1d   :  { %v579_v12 = vpop.eup %578  ;;  %v159_v26 = vsel %vm157_vm8, %v158_v53, %v156_v4  ;;  %vm185_vm0 = vcmp.eq.f32.partialorder %v819_v21, 0.0  ;;  %588 = vrsqrt.f32 %v833_v37  ;;  %v259_v29 = vsel %vm258_vm2, %v138_v63, 0.0 }
  0x1e   :  { %v170_v13 = vsel %vm169_vm11, %v795_v60, %v168_v5  ;;  %v182_v15 = vmul.f32 %v577_v6, %v819_v21  ;;  %v260_v16 = vsel %vm258_vm2, %v145_v7, 0.0  ;;  %v262_v17 = vsel %vm258_vm2, %v152_v9, 0.0 }
  0x1f   :  { %v581_v18 = vpop.eup %580  ;;  %v166_v38 = vsel %vm164_vm10, %v165_v59, %v163_v23  ;;  %v186_v19 = vand.u32 2147483648, %v819_v21  ;;  %590 = vrsqrt.f32 %v835_v39  ;;  %v261_v20 = vadd.f32 %v260_v16, %v259_v29 }
  0x20   :  { %v177_v22 = vsel %vm176_vm13, %v816_v14, %v175_v10  ;;  %v189_v24 = vmul.f32 %v579_v12, %v822_v30  ;;  %vm190_vm1 = vcmp.eq.f32.partialorder %v822_v30, inf  ;;  %v264_v25 = vsel %vm258_vm2, %v159_v26, 0.0 }
  0x21   :  { %v583_v27 = vpop.eup %582  ;;  %v173_v47 = vsel %vm171_vm12, %v172_v62, %v170_v13  ;;  %vm192_vm3 = vcmp.eq.f32.partialorder %v822_v30, 0.0  ;;  %592 = vrsqrt.f32 %v837_v40  ;;  %v263_v28 = vadd.f32 %v262_v17, %v261_v20 }
  0x22   :  { %v184_v31 = vsel %vm183_vm15, %v819_v21, %v182_v15  ;;  %v193_v36 = vand.u32 2147483648, %v822_v30  ;;  %v196_v43 = vmul.f32 %v581_v18, %v825_v32  ;;  %v266_v44 = vsel %vm258_vm2, %v166_v38, 0.0 }
  0x23   :  { %v585_v45 = vpop.eup %584  ;;  %v180_v60 = vsel %vm178_vm14, %v179_v11, %v177_v22  ;;  %vm197_vm4 = vcmp.eq.f32.partialorder %v825_v32, inf  ;;  %594 = vrsqrt.f32 %v840_v41  ;;  %v265_v46 = vadd.f32 %v264_v25, %v263_v28 }
  0x24   :  { %v191_v48 = vsel %vm190_vm1, %v822_v30, %v189_v24  ;;  %v200_v49 = vand.u32 2147483648, %v825_v32  ;;  %v203_v50 = vmul.f32 %v583_v27, %v827_v33  ;;  %v268_v51 = vsel %vm258_vm2, %v173_v47, 0.0 }
  0x25   :  { %v587_v52 = vpop.eup %586  ;;  %v187_v14 = vsel %vm185_vm0, %v186_v19, %v184_v31  ;;  %vm204_vm5 = vcmp.eq.f32.partialorder %v827_v33, inf  ;;  %596 = vrsqrt.f32 %v842_v42  ;;  %v267_v53 = vadd.f32 %v266_v44, %v265_v46 }
  0x26   :  { %v198_v54 = vsel %vm197_vm4, %v825_v32, %v196_v43  ;;  %vm199_vm6 = vcmp.eq.f32.partialorder %v825_v32, 0.0  ;;  %v210_v55 = vmul.f32 %v585_v45, %v829_v34  ;;  %v270_v56 = vsel %vm258_vm2, %v180_v60, 0.0 }
  0x27   :  { %v589_v57 = vpop.eup %588  ;;  %v194_v58 = vsel %vm192_vm3, %v193_v36, %v191_v48  ;;  %v207_v21 = vand.u32 2147483648, %v827_v33  ;;  %vm211_vm7 = vcmp.eq.f32.partialorder %v829_v34, inf  ;;  %v269_v59 = vadd.f32 %v268_v51, %v267_v53 }
  0x28   :  { %v205_v61 = vsel %vm204_vm5, %v827_v33, %v203_v50  ;;  %vm206_vm8 = vcmp.eq.f32.partialorder %v827_v33, 0.0  ;;  %v217_v62 = vmul.f32 %v587_v52, %v831_v35  ;;  %v272_v32 = vsel %vm258_vm2, %v187_v14, 0.0 }
  0x29   :  { %v591_v63 = vpop.eup %590  ;;  %v201_v4 = vsel %vm199_vm6, %v200_v49, %v198_v54  ;;  %v214_v5 = vand.u32 2147483648, %v829_v34  ;;  %vm218_vm9 = vcmp.eq.f32.partialorder %v831_v35, inf  ;;  %v271_v30 = vadd.f32 %v270_v56, %v269_v59 }
  0x2a   :  { %v212_v6 = vsel %vm211_vm7, %v829_v34, %v210_v55  ;;  %vm213_vm10 = vcmp.eq.f32.partialorder %v829_v34, 0.0  ;;  %v224_v7 = vmul.f32 %v589_v57, %v833_v37  ;;  %v274_v9 = vsel %vm258_vm2, %v194_v58, 0.0 }
  0x2b   :  { %v593_v33 = vpop.eup %592  ;;  %v208_v23 = vsel %vm206_vm8, %v207_v21, %v205_v61  ;;  %v221_v10 = vand.u32 2147483648, %v831_v35  ;;  %vm225_vm11 = vcmp.eq.f32.partialorder %v833_v37, inf  ;;  %v273_v11 = vadd.f32 %v272_v32, %v271_v30 }
  0x2c   :  { %v219_v12 = vsel %vm218_vm9, %v831_v35, %v217_v62  ;;  %vm220_vm12 = vcmp.eq.f32.partialorder %v831_v35, 0.0  ;;  %v231_v26 = vmul.f32 %v591_v63, %v835_v39  ;;  %v276_v29 = vsel %vm258_vm2, %v201_v4, 0.0 }
  0x2d   :  { %v595_v34 = vpop.eup %594  ;;  %v215_v13 = vsel %vm213_vm10, %v214_v5, %v212_v6  ;;  %v228_v15 = vand.u32 2147483648, %v833_v37  ;;  %vm232_vm13 = vcmp.eq.f32.partialorder %v835_v39, inf  ;;  %v275_v16 = vadd.f32 %v274_v9, %v273_v11  ;;  %v335_v11 = vld [vmem:[%s1078_s5] sm:$0xf] }
  0x2e   :  { %v226_v17 = vsel %vm225_vm11, %v833_v37, %v224_v7  ;;  %vm227_vm14 = vcmp.eq.f32.partialorder %v833_v37, 0.0  ;;  %v238_v18 = vmul.f32 %v593_v33, %v837_v40  ;;  %v278_v38 = vsel %vm258_vm2, %v208_v23, 0.0 }
  0x2f   :  { %v597_v35 = vpop.eup %596  ;;  %v222_v19 = vsel %vm220_vm12, %v221_v10, %v219_v12  ;;  %v235_v20 = vand.u32 2147483648, %v835_v39  ;;  %vm239_vm15 = vcmp.eq.f32.partialorder %v837_v40, inf  ;;  %v277_v22 = vadd.f32 %v276_v29, %v275_v16 }
  0x30   :  { %v233_v24 = vsel %vm232_vm13, %v835_v39, %v231_v26  ;;  %vm234_vm0 = vcmp.eq.f32.partialorder %v835_v39, 0.0  ;;  %v245_v25 = vmul.f32 %v595_v34, %v840_v41  ;;  %v280_v27 = vsel %vm258_vm2, %v215_v13, 0.0 }
  0x31   :  { %v229_v37 = vsel %vm227_vm14, %v228_v15, %v226_v17  ;;  %v242_v47 = vand.u32 2147483648, %v837_v40  ;;  %vm246_vm1 = vcmp.eq.f32.partialorder %v840_v41, inf  ;;  %v279_v28 = vadd.f32 %v278_v38, %v277_v22 }
  0x32   :  { %v240_v31 = vsel %vm239_vm15, %v837_v40, %v238_v18  ;;  %vm241_vm3 = vcmp.eq.f32.partialorder %v837_v40, 0.0  ;;  %v252_v36 = vmul.f32 %v597_v35, %v842_v42  ;;  %v282_v43 = vsel %vm258_vm2, %v222_v19, 0.0 }
  0x33   :  { %v236_v44 = vsel %vm234_vm0, %v235_v20, %v233_v24  ;;  %v249_v39 = vand.u32 2147483648, %v840_v41  ;;  %vm253_vm4 = vcmp.eq.f32.partialorder %v842_v42, inf  ;;  %v281_v45 = vadd.f32 %v280_v27, %v279_v28 }
  0x34   :  { %v247_v60 = vsel %vm246_vm1, %v840_v41, %v245_v25  ;;  %vm248_vm5 = vcmp.eq.f32.partialorder %v840_v41, 0.0  ;;  %v284_v46 = vsel %vm258_vm2, %v229_v37, 0.0  ;;  %v243_v48 = vsel %vm241_vm3, %v242_v47, %v240_v31 }
  0x35   :  { %v256_v49 = vand.u32 2147483648, %v842_v42  ;;  %v283_v40 = vadd.f32 %v282_v43, %v281_v45  ;;  %v254_v50 = vsel %vm253_vm4, %v842_v42, %v252_v36  ;;  %vm255_vm6 = vcmp.eq.f32.partialorder %v842_v42, 0.0 }
  0x36   :  { %v286_v51 = vsel %vm258_vm2, %v236_v44, 0.0  ;;  %v250_v52 = vsel %vm248_vm5, %v249_v39, %v247_v60  ;;  %v288_v53 = vsel %vm258_vm2, %v243_v48, 0.0  ;;  %v300_v59 = vlaneseq }
  0x37   :  { %v285_v14 = vadd.f32 %v284_v46, %v283_v40  ;;  %v257_v54 = vsel %vm255_vm6, %v256_v49, %v254_v50  ;;  %v290_v41 = vsel %vm258_vm2, %v250_v52, 0.0  ;;  %v610_v5 = vmov 0.0   ;;  %v384_v49 = vld [vmem:[%s1079_s7] sm:$0xf] }
  0x38   :  { %v292_v57 = vsel %vm258_vm2, %v257_v54, 0.0  ;;  %v996_v32 = vshrl.u32 %v300_v59, 7  ;;  %vm385_vm10 = vcmask 11264   ;;  %v417_v40 = vld [vmem:[%s1080_s8] sm:$0xf] }
  0x39   :  { %v287_v55 = vadd.f32 %v286_v51, %v285_v14  ;;  %v383_v54 = vld [vmem:[%s1081_s6] sm:$0xf] }
  0x3a   :  { %vm316_vm7 = vcmp.eq.s32.totalorder %v996_v32, 2  ;;  %vm307_vm8 = vcmp.eq.s32.totalorder %v996_v32, 1  ;;  %vm325_vm9 = vcmp.eq.s32.totalorder %v996_v32, 3  ;;  %vm302_vm2 = vcmp.eq.s32.totalorder %v996_v32, 0 }
  0x3b   :  { %v289_v56 = vadd.f32 %v288_v53, %v287_v55  ;;  %v537_v30 = vsel %vm316_vm7, 1.0, %v610_v5  ;;  %v536_v6 = vsel %vm307_vm8, 1.0, %v610_v5  ;;  %v538_v9 = vsel %vm325_vm9, 1.0, %v610_v5 }
  0x3c   :  { %v535_v29 = vsel %vm302_vm2, 1.0, %v610_v5  ;;  %v343_v18 = vsub.s32 0, %v996_v32  ;;  %v353_v38 = vsub.s32 1, %v996_v32  ;;  %v363_v24 = vsub.s32 2, %v996_v32 }
  0x3d   :  { %v291_v58 = vadd.f32 %v290_v41, %v289_v56  ;;  %v373_v37 = vsub.s32 3, %v996_v32 }
  0x3f   :  { %v293_v21 = vadd.f32 %v292_v57, %v291_v58 }
  0x41   :  { %v294_v61 = vrot.slane %v293_v21, 4 }
  0x43   :  { %v295_v62 = vadd.f32 %v294_v61, %v293_v21 }
  0x45   :  { %v296_v42 = vrot.slane %v295_v62, 2 }
  0x47   :  { %v297_v63 = vadd.f32 %v296_v42, %v295_v62  ;;  %v414_v62 = vstv %s1083_s0 }
  0x49   :  { %v298_v4 = vrot.slane %v297_v63, 1 }
  0x4b   :  { %v299_v7 = vadd.f32 %v298_v4, %v297_v63 }
  0x4d   :  { %v319_v33 = vmul.f32 %v537_v30, %v299_v7  ;;  %v310_v23 = vmul.f32 %v536_v6, %v299_v7  ;;  %v328_v10 = vmul.f32 %v538_v9, %v299_v7  ;;  %v305_v13 = vmul.f32 %v535_v29, %v299_v7 }
  0x4f   :  { %321 = vrot.lane.b32.xlu1 %v319_v33, %s611_s1  ;;  %312 = vrot.lane.b32.xlu0 %v310_v23, %s612_s2 }
  0x53   :  { %368 = vperm.xlu1 %553, %v684_v1   ;;  %330 = vrot.lane.b32.xlu0 %v328_v10, %s613_s19 }
  0x57   :  { %379 = vperm.xlu0 %550, %v335_v11   ;;  %554 = vset.pattern.permute.xlu1 %v607_v2 }
  0x81   :  { %v349_v12 = vpop.permute.xlu1 %348  ;;  %v339_v26 = vpop.permute.xlu0 %338 }
  0x86   :  { %v359_v34 = vpop.permute.xlu1 %358 }
  0xc1   :  { %v313_v15 = vpop.permute.xlu0 %312  ;;  %v322_v17 = vpop.permute.xlu1 %321 }
  0xc2   :  { %v315_v16 = vadd.f32 %v313_v15, %v305_v13 }
  0xc4   :  { %v324_v1 = vadd.f32 %v322_v17, %v315_v16  ;;  %v466_v17 = vld [vmem:[%s1084_s10] sm:$0xf] }
  0xc5   :  { %v331_v35 = vpop.permute.xlu0 %330 }
  0xc6   :  { %v1009_v19 = vadd.f32 %v331_v35, %v324_v1 }
  0xc8   :  { %v344_v20 = vrot.slane %v1009_v19, %v343_v18  ;;  %v354_v22 = vrot.slane %v1009_v19, %v353_v38  ;;  %v364_v47 = vrot.slane %v1009_v19, %v363_v24  ;;  %v374_v31 = vrot.slane %v1009_v19, %v373_v37 }
  0xca   :  { %v345_v25 = vmul.f32 %v344_v20, %v339_v26  ;;  %v355_v27 = vmul.f32 %v354_v22, %v349_v12  ;;  %v365_v36 = vmul.f32 %v364_v47, %v359_v34  ;;  %v467_v22 = vld [vmem:[%s1085_s11] sm:$0xf] }
  0xcc   :  { %v356_v28 = vadd.f32 %v355_v27, %v345_v25 }
  0xce   :  { %v366_v39 = vadd.f32 %v365_v36, %v356_v28 }
  0xd2   :  { %v369_v43 = vpop.permute.xlu1 %368 }
  0xd3   :  { %v375_v44 = vmul.f32 %v374_v31, %v369_v43 }
  0xd5   :  { %v376_v45 = vadd.f32 %v375_v44, %v366_v39 }
  0xd6   :  { %v380_v60 = vpop.permute.xlu0 %379 }
  0xd7   :  { %v382_v46 = vadd.f32 %v380_v60, %v376_v45 }
  0xd9   :  { %v386_v48 = vsel %vm385_vm10, %v382_v46, 0.0 }
  0xda   :  { %387 = vadd.xlane.f32.xlu1 %v386_v48 }
  0xeb   :  { %408 = vperm.xlu1 %554, %v384_v49   ;;  %v614_v49 = vmov 839922192  }
  0xef   :  { %421 = vperm.xlu1 %554, %v417_v40  }
  0xf3   :  { %556 = vset.pattern.permute.xlu1 %v608_v3  ;;  %v418_v3 = vld [vmem:[%s1082_s9] sm:$0xf] }
  0xf4   :  { %441 = vperm.xlu1 %556, %v417_v40  }
  0xf8   :  { %557 = vset.pattern.permute.xlu1 %v609_v8 }
  0xf9   :  { %451 = vperm.xlu1 %557, %v417_v40  }
  0xfd   :  { %559 = vset.pattern.permute.xlu1 %v607_v2 }
 0x167   :  { %v388_v50 = vpop.xlane.xlu1 %387 }
 0x168   :  { %v390_v51 = vmul.f32 0.5, %v388_v50 }
 0x16a   :  { %v391_v52 = vsub.f32 %v382_v46, %v390_v51 }
 0x16b   :  { %v409_v56 = vpop.permute.xlu1 %408 }
 0x16c   :  { %v392_v14 = vmul.f32 %v391_v52, %v391_v52 }
 0x16e   :  { %v393_v53 = vsel %vm385_vm10, %v392_v14, 0.0 }
 0x16f   :  { %394 = vadd.xlane.f32.xlu0 %v393_v53  ;;  %v422_v61 = vpop.permute.xlu1 %421 }
 0x173   :  { %v442_v4 = vpop.permute.xlu1 %441 }
 0x178   :  { %v452_v10 = vpop.permute.xlu1 %451 }
 0x185   :  { %402 = vperm.xlu0 %550, %v383_v54  }
 0x189   :  { %555 = vset.pattern.permute.xlu0 %v606_v0 }
 0x18a   :  { %431 = vperm.xlu0 %555, %v417_v40   ;;  %v506_v40 = vunpack.c.l.s4 %v614_v49 }
 0x18c   :  { %v507_v50 = vunpack.c.0.s8 %v506_v40 }
 0x18e   :  { %558 = vset.pattern.permute.xlu0 %v607_v2  ;;  %v510_v51 = vsub.s32 %v507_v50, %v996_v32 }
 0x18f   :  { %462 = vperm.xlu0 %558, %v418_v3  }
 0x1fc   :  { %v395_v8 = vpop.xlane.xlu0 %394 }
 0x1fd   :  { %v396_v55 = vmul.f32 0.5, %v395_v8 }
 0x1ff   :  { %v397_v41 = vadd.f32 1e-05, %v396_v55 }
 0x201   :  { %598 = vrsqrt.f32 %v397_v41 }
 0x204   :  { %v403_v21 = vpop.permute.xlu0 %402 }
 0x209   :  { %v432_v5 = vpop.permute.xlu0 %431 }
 0x20b   :  { %v599_v57 = vpop.eup %598 }
 0x20c   :  { %v399_v58 = vmul.f32 %v599_v57, %v391_v52 }
 0x20e   :  { %v405_v59 = vmul.f32 %v403_v21, %v399_v58  ;;  %v463_v34 = vpop.permute.xlu0 %462 }
 0x210   :  { %v411_v42 = vadd.f32 %v409_v56, %v405_v59 }
 0x212   :  { %vm413_vm11 = vcmp.ge.f32.partialorder %v411_v42, 0.0  ;;  %v415_v63 = vmul.f32 %v414_v62, %v411_v42 }
 0x214   :  { %v416_v2 = vsel %vm413_vm11, %v411_v42, %v415_v63 }
 0x215   :  { %v427_v30 = vrot.slane %v416_v2, %v343_v18  ;;  %v447_v6 = vrot.slane %v416_v2, %v363_v24  ;;  %v437_v7 = vrot.slane %v416_v2, %v353_v38  ;;  %v457_v23 = vrot.slane %v416_v2, %v373_v37 }
 0x217   :  { %v428_v9 = vmul.f32 %v427_v30, %v422_v61  ;;  %v438_v33 = vmul.f32 %v437_v7, %v432_v5  ;;  %v448_v11 = vmul.f32 %v447_v6, %v442_v4  ;;  %v458_v26 = vmul.f32 %v457_v23, %v452_v10 }
 0x219   :  { %v439_v12 = vadd.f32 %v438_v33, %v428_v9 }
 0x21b   :  { %v449_v29 = vadd.f32 %v448_v11, %v439_v12 }
 0x21d   :  { %v459_v13 = vadd.f32 %v458_v26, %v449_v29 }
 0x21f   :  { %v465_v15 = vadd.f32 %v463_v34, %v459_v13 }
 0x221   :  { %v468_v16 = vsel %vm385_vm10, %v465_v15, 0.0 }
 0x222   :  { %469 = vadd.xlane.f32.xlu1 %v468_v16 }
 0x233   :  { %483 = vperm.xlu1 %559, %v466_v17  }
 0x2af   :  { %v470_v1 = vpop.xlane.xlu1 %469 }
 0x2b0   :  { %v471_v18 = vmul.f32 0.5, %v470_v1 }
 0x2b2   :  { %v472_v38 = vsub.f32 %v465_v15, %v471_v18 }
 0x2b3   :  { %v484_v47 = vpop.permute.xlu1 %483 }
 0x2b4   :  { %v473_v35 = vmul.f32 %v472_v38, %v472_v38 }
 0x2b6   :  { %v474_v20 = vsel %vm385_vm10, %v473_v35, 0.0 }
 0x2b7   :  { %475 = vadd.xlane.f32.xlu0 %v474_v20 }
 0x2cd   :  { %489 = vperm.xlu0 %558, %v467_v22  }
 0x2d1   :  { %561 = vset.pattern.permute.xlu0 %v606_v0 }
 0x344   :  { %v476_v24 = vpop.xlane.xlu0 %475 }
 0x345   :  { %v477_v25 = vmul.f32 0.5, %v476_v24 }
 0x347   :  { %v478_v27 = vadd.f32 1e-05, %v477_v25 }
 0x349   :  { %600 = vrsqrt.f32 %v478_v27 }
 0x34c   :  { %v490_v36 = vpop.permute.xlu0 %489 }
 0x353   :  { %v601_v37 = vpop.eup %600 }
 0x354   :  { %v480_v28 = vmul.f32 %v601_v37, %v472_v38 }
 0x356   :  { %v486_v31 = vmul.f32 %v484_v47, %v480_v28 }
 0x358   :  { %v492_v43 = vadd.f32 %v490_v36, %v486_v31 }
 0x35a   :  { %v493_v44 = vadd.f32 %v492_v43, %v1009_v19  ;;  %v500_v19 = vld [vmem:[%s1086_s3] sm:$0xff] }
 0x35c   :  { %v494_v39 = vsub.f32 0.0, %v493_v44 }
 0x35e   :  { %v495_v45 = vmul.f32 1.442695, %v494_v39 }
 0x360   :  { %602 = vpow2.f32 %v495_v45 }
 0x36a   :  { %v603_v60 = vpop.eup %602 }
 0x36b   :  { %v497_v46 = vadd.f32 1.0, %v603_v60 }
 0x36d   :  { %604 = vrcp.f32 %v497_v46 }
 0x377   :  { %v605_v48 = vpop.eup %604 }
 0x378   :  { %503 = vperm.xlu1 %559, %v605_v48  }
 0x37c   :  { %560 = vset.pattern.permute.xlu1 %v606_v0  ;;  %v539_v0 = vld [vmem:[%s1086_s3 + $0x8] sm:$0xff] }
 0x37d   :  { %518 = vperm.xlu1 %560, %v605_v48  }
 0x3f7   :  { %v504_v52 = vpop.permute.xlu1 %503 }
 0x3f8   :  { %v511_v14 = vrot.slane %v504_v52, %v510_v51 }
 0x3fa   :  { %v513_v53 = vmul.f32 %v511_v14, %v500_v19 }
 0x3fc   :  { %514 = vst [vmem:[%s1087_s12] sm:$0xff] %v513_v53  ;;  %v519_v54 = vpop.permute.xlu1 %518 }
 0x3fd   :  { %v526_v3 = vrot.slane %v519_v54, %v510_v51 }
 0x3ff   :  { %v528_v8 = vmul.f32 %v539_v0, %v526_v3 }
 0x401   :  { %540 = vst [vmem:[%s1087_s12 + $0x8] sm:$0xff] %v528_v8 }

</bundles_post_ra>
